<compile_context>
chip_gen: v6e
topology: v6e:2x2x1
jax: 0.10.0
libtpu: 0.0.40
codegen_flags: <defaults>
</compile_context>

<pallas_src>
import functools

import jax
import jax.numpy as jnp
from jax.experimental import pallas as pl
from jax.experimental.pallas import tpu as pltpu


def _poisson_encoder_kernel(obs_ref, mean_ref, inv_var_ref, bits_ref, out_ref):
    # obs/mean/inv_var: (1, M) f32, resident across the whole grid.
    # bits:             (t_tile, M) int31 uniform randoms in [0, 2^31).
    # out:              (t_tile, M) spikes.
    diff = obs_ref[...] - mean_ref[...]                                   # (1, M)
    pop_act = jnp.exp(jnp.float32(-0.5) * diff * diff * inv_var_ref[...])  # (1, M)

    # Integer Bernoulli threshold: P(spike) = thresh / 2^31, capped at 1 - 2^-24.
    pop_act = jnp.minimum(pop_act, jnp.float32(1.0 - 2.0 ** -24))
    thresh = (pop_act * jnp.float32(2.0 ** 31)).astype(jnp.int32)          # (1, M)

    # Hot path: one integer compare + convert per output element.
    out_ref[...] = (bits_ref[...] < thresh).astype(out_ref.dtype)          # (t_tile, M)


def pop_spike_encoder_poisson(obs, mean, std, spike_ts, key, *,
                              out_dtype=jnp.float32,
                              time_major=False,
                              block_bytes=4 * 1024 * 1024):
    """
    obs:  (batch, obs_dim) float
    mean: (1, obs_dim, pop_dim) float   (learnable param, torch layout)
    std:  (1, obs_dim, pop_dim) float
    key:  jax PRNG key for the Poisson (Bernoulli-per-step) spike draws
    returns pop_spikes:
        time_major=False -> (batch, obs_dim*pop_dim, spike_ts)   [torch layout]
        time_major=True  -> (spike_ts, batch, obs_dim*pop_dim)   [no final transpose,
                             natural order for a downstream SNN time loop]
    """
    batch, obs_dim = obs.shape
    pop_dim = mean.shape[-1]
    neuron = obs_dim * pop_dim
    m = batch * neuron  # lane axis

    # --- wrapper glue (tiny, fused by XLA) -----------------------------------
    obs_f = obs.astype(jnp.float32)
    # obs.view(-1, obs_dim, 1) broadcast against (1, obs_dim, pop_dim), C-order flatten
    # == repeat each obs value pop_dim times along the neuron axis.
    obs_rep = jnp.repeat(obs_f, pop_dim, axis=1)                      # (B, N)
    mean_n = mean.reshape(1, neuron).astype(jnp.float32)              # (1, N)
    inv_var_n = (1.0 / (std.astype(jnp.float32) ** 2)).reshape(1, neuron)

    # Flatten (B, N) -> M on the lane axis (lane-dense output per review).
    obs_flat = obs_rep.reshape(1, m)
    mean_flat = jnp.broadcast_to(mean_n, (batch, neuron)).reshape(1, m)
    inv_var_flat = jnp.broadcast_to(inv_var_n, (batch, neuron)).reshape(1, m)

    # Uniform int31 randoms, independent per (t, b, n).  Shift done here so the
    # in-kernel hot path is a plain signed int32 compare.
    bits_u32 = jax.random.bits(key, (spike_ts, m), dtype=jnp.uint32)
    bits_i31 = (bits_u32 >> 1).astype(jnp.int32)                      # (T, M)

    # --- tiling over spike_ts -------------------------------------------------
    bytes_per_row = m * 4
    rows_budget = max(1, block_bytes // bytes_per_row)
    if rows_budget >= spike_ts:
        t_tile = spike_ts                       # single block covers all timesteps
    else:
        # multiple of 8 keeps the sublane block constraint satisfied for any T
        t_tile = max(8, (rows_budget // 8) * 8)
    grid = (pl.cdiv(spike_ts, t_tile),)

    row_spec = pl.BlockSpec((1, m), lambda t: (0, 0))                 # resident
    step_spec = pl.BlockSpec((t_tile, m), lambda t: (t, 0))           # pipelined

    out = pl.pallas_call(
        _poisson_encoder_kernel,
        out_shape=jax.ShapeDtypeStruct((spike_ts, m), out_dtype),
        grid=grid,
        in_specs=[row_spec, row_spec, row_spec, step_spec],
        out_specs=step_spec,
        compiler_params=pltpu.CompilerParams(
            dimension_semantics=("parallel",),
        ),
    )(obs_flat, mean_flat, inv_var_flat, bits_i31)

    out = out.reshape(spike_ts, batch, neuron)     # free (row-major identical)
    if time_major:
        return out
    # Torch layout (batch, neuron, spike_ts).  Costs one extra HBM round trip; pass
    # time_major=True to skip it if the consumer iterates over time anyway.
    return jnp.transpose(out, (1, 2, 0))


def init_params(obs_dim, pop_dim, mean_range, std):
    """Deterministic parameter init mirroring the torch __init__."""
    delta_mean = (mean_range[1] - mean_range[0]) / (pop_dim - 1)
    mean_row = mean_range[0] + delta_mean * jnp.arange(pop_dim, dtype=jnp.float32)
    mean = jnp.broadcast_to(mean_row, (1, obs_dim, pop_dim))
    std_p = jnp.full((1, obs_dim, pop_dim), std, dtype=jnp.float32)
    return mean, std_p


def _reference(obs, mean, std, bits_i31, spike_ts, out_dtype=jnp.float32):
    """Pure-JAX reference using the same random bits (for agreement check)."""
    batch, obs_dim = obs.shape
    pop_dim = mean.shape[-1]
    neuron = obs_dim * pop_dim
    inv_var = 1.0 / (std.astype(jnp.float32) ** 2)
    diff = obs.astype(jnp.float32)[:, :, None] - mean.astype(jnp.float32)
    pop_act = jnp.exp(-0.5 * diff * diff * inv_var).reshape(batch, neuron)
    pop_act = jnp.minimum(pop_act, jnp.float32(1.0 - 2.0 ** -24))
    thresh = (pop_act * jnp.float32(2.0 ** 31)).astype(jnp.int32)      # (B, N)
    spikes = (bits_i31.reshape(spike_ts, batch, neuron) < thresh[None]).astype(out_dtype)
    return jnp.transpose(spikes, (1, 2, 0))                            # (B, N, T)


if __name__ == "__main__":
    obs_dim = 4
    pop_dim = 8
    spike_ts = 8
    batch = 2
    mean_range = (-3.0, 3.0)
    std_val = 0.5

    mean, std = init_params(obs_dim, pop_dim, mean_range, std_val)

    root = jax.random.PRNGKey(0)
    k_obs, k_bits = jax.random.split(root)
    obs = jax.random.normal(k_obs, (batch, obs_dim), dtype=jnp.float32)

    pop_spikes = pop_spike_encoder_poisson(obs, mean, std, spike_ts, k_bits)
    pop_spikes = jax.block_until_ready(pop_spikes)

    neuron = obs_dim * pop_dim
    assert pop_spikes.shape == (batch, neuron, spike_ts)
    assert pop_spikes.dtype == jnp.float32
    # spikes must be binary
    assert bool(jnp.all((pop_spikes == 0.0) | (pop_spikes == 1.0)))

    # time-major (transpose-free) path
    tm = pop_spike_encoder_poisson(obs, mean, std, spike_ts, k_bits, time_major=True)
    tm = jax.block_until_ready(tm)
    assert tm.shape == (spike_ts, batch, neuron)

    # agreement with a pure-JAX reference that reuses the exact same random bits
    bits_u32 = jax.random.bits(k_bits, (spike_ts, batch * neuron), dtype=jnp.uint32)
    bits_i31 = (bits_u32 >> 1).astype(jnp.int32)
    ref = _reference(obs, mean, std, bits_i31, spike_ts)
    agree = jnp.mean((ref == pop_spikes).astype(jnp.float32))
    assert float(agree) >= 0.99, f"agreement with reference too low: {float(agree)}"

    print("KERNEL_OK")
</pallas_src>

<mosaic_0001>
module attributes {stable_mosaic.version = 11 : i64} {
  func.func @_poisson_encoder_kernel(%arg0: i32, %arg1: memref<1x64xf32, #tpu.memory_space<vmem>>, %arg2: memref<1x64xf32, #tpu.memory_space<vmem>>, %arg3: memref<1x64xf32, #tpu.memory_space<vmem>>, %arg4: memref<8x64xi32, #tpu.memory_space<vmem>>, %arg5: memref<8x64xf32, #tpu.memory_space<vmem>>) attributes {dimension_semantics = [#tpu.dimension_semantics<parallel>], iteration_bounds = array<i64: 1>, scalar_prefetch = 0 : i64, scratch_operands = 0 : i64, tpu.core_type = #tpu.core_type<tc>, window_params = [{pipeline_mode = #tpu.pipeline_mode<synchronous>, transform_indices = @transform_0, window_bounds = array<i64: 1, 64>}, {pipeline_mode = #tpu.pipeline_mode<synchronous>, transform_indices = @transform_1, window_bounds = array<i64: 1, 64>}, {pipeline_mode = #tpu.pipeline_mode<synchronous>, transform_indices = @transform_2, window_bounds = array<i64: 1, 64>}, {transform_indices = @transform_3, window_bounds = array<i64: 8, 64>}, {transform_indices = @transform_4, window_bounds = array<i64: 8, 64>}]} {
    %c0 = arith.constant 0 : index
    %c0_0 = arith.constant 0 : index
    %0 = vector.load %arg1[%c0, %c0_0] : memref<1x64xf32, #tpu.memory_space<vmem>>, vector<1x64xf32>
    %c0_1 = arith.constant 0 : index
    %c0_2 = arith.constant 0 : index
    %1 = vector.load %arg2[%c0_1, %c0_2] : memref<1x64xf32, #tpu.memory_space<vmem>>, vector<1x64xf32>
    %2 = arith.subf %0, %1 : vector<1x64xf32>
    %cst = arith.constant -5.000000e-01 : f32
    %3 = vector.broadcast %cst : f32 to vector<1x64xf32>
    %4 = arith.mulf %3, %2 : vector<1x64xf32>
    %5 = arith.mulf %4, %2 : vector<1x64xf32>
    %c0_3 = arith.constant 0 : index
    %c0_4 = arith.constant 0 : index
    %6 = vector.load %arg3[%c0_3, %c0_4] : memref<1x64xf32, #tpu.memory_space<vmem>>, vector<1x64xf32>
    %7 = arith.mulf %5, %6 : vector<1x64xf32>
    %8 = math.exp %7 : vector<1x64xf32>
    %cst_5 = arith.constant 0.99999994 : f32
    %9 = vector.broadcast %cst_5 : f32 to vector<1x64xf32>
    %10 = arith.minimumf %8, %9 : vector<1x64xf32>
    %cst_6 = arith.constant 2.14748365E+9 : f32
    %11 = vector.broadcast %cst_6 : f32 to vector<1x64xf32>
    %12 = arith.mulf %10, %11 : vector<1x64xf32>
    %13 = arith.fptosi %12 : vector<1x64xf32> to vector<1x64xi32>
    %c0_7 = arith.constant 0 : index
    %c0_8 = arith.constant 0 : index
    %14 = vector.load %arg4[%c0_7, %c0_8] : memref<8x64xi32, #tpu.memory_space<vmem>>, vector<8x64xi32>
    %15 = vector.broadcast %13 : vector<1x64xi32> to vector<8x64xi32>
    %16 = arith.cmpi slt, %14, %15 : vector<8x64xi32>
    %17 = arith.extui %16 : vector<8x64xi1> to vector<8x64xi32>
    %18 = arith.sitofp %17 : vector<8x64xi32> to vector<8x64xf32>
    %c0_9 = arith.constant 0 : index
    %c0_10 = arith.constant 0 : index
    %19 = vector.load %arg5[%c0_9, %c0_10] : memref<8x64xf32, #tpu.memory_space<vmem>>, vector<8x64xf32>
    tpu.vector_store %arg5[%c0_9, %c0_10], %18 {strides = array<i32>} : memref<8x64xf32, #tpu.memory_space<vmem>>, vector<8x64xf32>,
    return
  }
  func.func @transform_0(%arg0: i32) -> (i32, i32) {
    %c0_i32 = arith.constant 0 : i32
    %c0_i32_0 = arith.constant 0 : i32
    %c0_i32_1 = arith.constant 0 : i32
    return %c0_i32, %c0_i32_0 : i32, i32
  }
  func.func @transform_1(%arg0: i32) -> (i32, i32) {
    %c0_i32 = arith.constant 0 : i32
    %c0_i32_0 = arith.constant 0 : i32
    %c0_i32_1 = arith.constant 0 : i32
    return %c0_i32, %c0_i32_0 : i32, i32
  }
  func.func @transform_2(%arg0: i32) -> (i32, i32) {
    %c0_i32 = arith.constant 0 : i32
    %c0_i32_0 = arith.constant 0 : i32
    %c0_i32_1 = arith.constant 0 : i32
    return %c0_i32, %c0_i32_0 : i32, i32
  }
  func.func @transform_3(%arg0: i32) -> (i32, i32) {
    %c0_i32 = arith.constant 0 : i32
    %c0_i32_0 = arith.constant 0 : i32
    return %arg0, %c0_i32 : i32, i32
  }
  func.func @transform_4(%arg0: i32) -> (i32, i32) {
    %c0_i32 = arith.constant 0 : i32
    %c0_i32_0 = arith.constant 0 : i32
    return %arg0, %c0_i32 : i32, i32
  }
}

</mosaic_0001>

<bundles_post_ra>
// kernel: tpu_custom_call.1
= control target key start
LH: loop header
LB: loop body
LE: loop exit
PB: predicated region body
PF: predicated region fallthrough
CT: control target
= control target key end

     0   :  { %9 = vsyncpa [#allocation3], 0  ;;  %s199_s0 = inlined_call_operand.hbm [shape: f32[1,64], index: 0, kind: input, shape index: {}]   ;;  %s200_s1 = inlined_call_operand.vmem [shape: f32[1,64], index: 1, kind: input, shape index: {}]   ;;  %s201_s2 = inlined_call_operand.vmem [shape: f32[1,64], index: 2, kind: input, shape index: {}]   ;;  %s202_s3 = inlined_call_operand.hbm [shape: s32[8,64], index: 3, kind: input, shape index: {}]   ;;  %s203_s4 = inlined_call_operand.hbm [shape: f32[8,64], index: 4, kind: output, shape index: {}]  }
   0x1   :  { %10 = vsyncpa [#allocation6], 0 }
   0x2   :  { %11 = vsyncpa [#allocation4], 0  ;;  %s155_s15 = smov [#allocation2]   ;;  %s156_s17 = smov [#allocation5]  }
   0x3   :  { %s18_s16 = sshll.u32 %s155_s15, 4  ;;  %s32_s18 = sshll.u32 %s156_s17, 4  ;;  %s19_s16 = int_to_ptr.vmem [resolvable:$true] %s18_s16  ;;  %s33_s18 = int_to_ptr.vmem [resolvable:$true] %s32_s18 }
   0x4   :  { %s97_s19 = scalar_lea.vmem %s19_s16, 16  ;;  %s101_s20 = scalar_lea.vmem %s19_s16, 32 }
   0x5   :  { %p98_p0 = scmp.ne.s32.totalorder %s19_s16, %s97_s19  ;;  %p102_p1 = scmp.lt.s32.totalorder %s19_s16, %s19_s16 }
   0x6   :  { %p103_p2 = scmp.lt.s32.totalorder %s101_s20, %s97_s19 }
   0x8   :  { %p104_p3 = por %p103_p2, %p102_p1 }
   0xa   :  { %p105_p4 = pnand %p104_p3, %p98_p0 }
   0xc   :  { %108 = shalt.err (!%p105_p4)
}
   0xd   :  { %21 = dma.hbm_to_vmem [thread:$0]  %s199_s0, 16, %s19_s16, [#allocation3]  }
   0xe   :  { %s117_s23 = scalar_lea.vmem %s33_s18, 128  ;;  %p122_p6 = scmp.lt.s32.totalorder %s33_s18, %s33_s18 }
   0xf   :  { %p118_p5 = scmp.ne.s32.totalorder %s33_s18, %s117_s23  ;;  %p123_p7 = scmp.lt.s32.totalorder %s117_s23, %s117_s23 }
  0x11   :  { %p124_p8 = por %p123_p7, %p122_p6 }
  0x13   :  { %p125_p9 = pnand %p124_p8, %p118_p5 }
  0x15   :  { %128 = shalt.err (!%p125_p9)
}
  0x16   :  { %35 = dma.hbm_to_vmem [thread:$0]  %s202_s3, 128, %s33_s18, [#allocation6]  }
  0x17   :  { %149 = dma.done.wait [#allocation3], 16  }
  0x18   :  { %150 = vsyncadd [#allocation3], 4294967280 }
  0x19   :  { %151 = dma.done.wait [#allocation6], 128  }
  0x1a   :  { %152 = vsyncadd [#allocation6], 4294967168  ;;  %v42_v0 = vld [vmem:[#allocation2] sm:$0x1]  ;;  %v55_v8 = vlaneseq  ;;  %v54_v16 = vld [vmem:[#allocation5] sm:$0xff]  ;;  %vm62_vm0 = vcmask 523264  }
  0x1b   :  { %v43_v1 = vld [vmem:[%s200_s1] sm:$0x1]  ;;  %s157_s1 = smov [#allocation7]   ;;  %v158_v18 = vmov 0.0  }
  0x1c   :  { %v44_v2 = vsub.f32 %v42_v0, %v43_v1  ;;  %v47_v4 = vld [vmem:[%s201_s2] sm:$0x1]  ;;  %v56_v11 = vshrl.u32 %v55_v8, 7  ;;  %s70_s3 = sshll.u32 %s157_s1, 4  ;;  %s71_s3 = int_to_ptr.vmem [resolvable:$true] %s70_s3 }
  0x1d   :  { %s129_s2 = scalar_lea.vmem %s71_s3, 128  ;;  %p134_p11 = scmp.lt.s32.totalorder %s71_s3, %s71_s3 }
  0x1e   :  { %v45_v3 = vmul.f32 -0.5, %v44_v2  ;;  %v57_v14 = vsub.s32 0, %v56_v11  ;;  %p130_p10 = scmp.ne.s32.totalorder %s71_s3, %s129_s2  ;;  %p135_p12 = scmp.lt.s32.totalorder %s129_s2, %s129_s2 }
  0x20   :  { %v46_v5 = vmul.f32 %v45_v3, %v44_v2  ;;  %p136_p13 = por %p135_p12, %p134_p11 }
  0x22   :  { %v48_v6 = vmul.f32 %v47_v4, %v46_v5  ;;  %p137_p0 = pnand %p136_p13, %p130_p10 }
  0x24   :  { %v49_v7 = vmul.f32 1.442695, %v48_v6 }
  0x26   :  { %87 = vpow2.f32 %v49_v7 }
  0x33   :  { %v88_v9 = vpop.eup %87 }
  0x34   :  { %v51_v10 = vmin.f32 %v88_v9, 0.99999994 }
  0x36   :  { %v52_v12 = vmul.f32 2.1474836e+09, %v51_v10 }
  0x38   :  { %v81_v13 = vtrunc.f32 %v52_v12 }
  0x3a   :  { %v82_v15 = vcvt.f32.s32 %v81_v13 }
  0x3c   :  { %v58_v17 = vrot.slane %v82_v15, %v57_v14 }
  0x3e   :  { %vm59_vm1 = vcmp.lt.s32.totalorder %v54_v16, %v58_v17 }
  0x3f   :  { %v80_v19 = vsel %vm59_vm1, 1.0, %v158_v18 }
  0x40   :  { %63 = vst.msk [vmem:[#allocation7] sm:$0xff] %vm62_vm0, %v80_v19 }
  0x41   :  { %140 = shalt.err (!%p137_p0)
}
  0x42   :  { %73 = dma.vmem_to_hbm [thread:$0]  %s71_s3, 128, %s203_s4, [#allocation4]  }
  0x43   :  { %153 = dma.done.wait [#allocation4], 128  }
  0x44   :  { %154 = vsyncadd [#allocation4], 4294967168 }
  0x45   :  { %77 = vsyncpa [#allocation3], 1 }
  0x46   :  { %78 = vsyncpa [#allocation6], 1 }
  0x47   :  { %79 = vsyncpa [#allocation4], 1 }

</bundles_post_ra>
